<compile_context>
chip_gen: v7x
topology: tpu7x:2x2x1
jax: 0.10.0
libtpu: 0.0.40
codegen_flags: <defaults>
</compile_context>

<pallas_src>
import math
import functools

import jax
import jax.numpy as jnp
from jax.experimental import pallas as pl
from jax.experimental.pallas import tpu as pltpu

EPS = 1e-5                     # LayerNorm eps (torch default / CLIP)
ATTN_SCORE_BUDGET = 12 << 20   # max bytes of live f32 attention scores per head-group


def _round_up(a, b):
    return (a + b - 1) // b * b


def _layernorm(x, g, b):
    # x: (M, D); g, b: (1, D).  Matches torch LayerNorm (biased variance, f32 math).
    x = x.astype(jnp.float32)
    mu = jnp.mean(x, axis=-1, keepdims=True)
    var = jnp.mean(jnp.square(x - mu), axis=-1, keepdims=True)
    return (x - mu) * jax.lax.rsqrt(var + EPS) * g + b


# ---------------------------------------------------------------------------
# Pallas kernels
# ---------------------------------------------------------------------------

def patch_embed_kernel(p_ref, w_ref, o_ref):
    # Conv2d(kernel=stride=patch, bias=False) as a row-tiled GEMM on flattened patches.
    o_ref[...] = jnp.dot(p_ref[...], w_ref[...], preferred_element_type=jnp.float32)


def vit_blocks_kernel(x_hbm_ref, pre_w_ref, pre_b_ref,
                      ln1_w_ref, ln1_b_ref, qkv_w_ref, qkv_b_ref,
                      out_w_ref, out_b_ref, ln2_w_ref, ln2_b_ref,
                      fc1_w_ref, fc1_b_ref, fc2_w_ref, fc2_b_ref,
                      post_w_ref, post_b_ref,
                      out_ref,
                      act_ref, copy_sem,
                      *, batch, seq_len, seq_pad, num_heads, heads_per_group):
    """One grid step = one PEFT_Block (pre-norm attention + pre-norm MLP).

    act_ref (VMEM, (N*Lp, D) f32) carries the activations across grid steps.
    Step 0:   DMA x from HBM + fused ln_pre.
    Step B-1: fused ln_post on the class token -> (N, D) output.
    """
    i = pl.program_id(0)
    nb = pl.num_programs(0)
    rows_p, d_model = act_ref.shape
    hd = d_model // num_heads
    n_groups = -(-num_heads // heads_per_group)
    scale = 1.0 / math.sqrt(hd)
    f32 = jnp.float32
    bf16 = jnp.bfloat16

    # ----- step 0: bring the (padded) token activations in and fuse ln_pre -----
    @pl.when(i == 0)
    def _():
        cp = pltpu.make_async_copy(x_hbm_ref, act_ref, copy_sem)
        cp.start()
        cp.wait()
        act_ref[...] = _layernorm(act_ref[...], pre_w_ref[...], pre_b_ref[...])

    # ----- attention (norm_first=True):  x <- x + out_proj(MHA(ln1(x))) -----
    h_bf = _layernorm(act_ref[...], ln1_w_ref[0], ln1_b_ref[0]).astype(bf16)   # (rows_p, D)

    key_ok = None
    if seq_pad > seq_len:   # mask padded key positions (queries on pad rows are discarded)
        key_ok = jax.lax.broadcasted_iota(jnp.int32, (1, 1, seq_pad), 2) < seq_len

    attn_parts = []
    for g in range(n_groups):
        h0 = g * heads_per_group
        hg = min(heads_per_group, num_heads - h0)
        w = hg * hd
        c0 = h0 * hd

        def _proj(off, c0=c0, w=w):
            # Per-group projection from bf16 weight-column slices: the only f32
            # intermediate is (rows_p, w); cast to bf16 right after the bias add.
            y = jnp.dot(h_bf, qkv_w_ref[0, :, off + c0:off + c0 + w],
                        preferred_element_type=f32)
            y = y + qkv_b_ref[0, :, off + c0:off + c0 + w]
            return y.astype(bf16)                                  # (rows_p, w) bf16

        q2 = _proj(0)
        k2 = _proj(d_model)
        v2 = _proj(2 * d_model)

        def _split_heads(t, hg=hg):
            # (rows_p, hg*hd) -> (hg*N, Lp, hd): per-head lane slices stacked on a new
            # leading axis, then a tile-aligned (Lp % 8 == 0) batch/seq reshape.
            parts = [t[:, j * hd:(j + 1) * hd] for j in range(hg)]
            t3 = parts[0][None] if hg == 1 else jnp.stack(parts, axis=0)
            return t3.reshape(hg * batch, seq_pad, hd)

        qb = _split_heads(q2)
        kb = _split_heads(k2)
        vb = _split_heads(v2)

        s = jnp.einsum('bqd,bkd->bqk', qb, kb, preferred_element_type=f32) * scale
        if key_ok is not None:
            s = jnp.where(key_ok, s, -1e30)
        s = s - jnp.max(s, axis=-1, keepdims=True)
        p = jnp.exp(s)
        p = p / jnp.sum(p, axis=-1, keepdims=True)                 # exact softmax divide
        ob = jnp.einsum('bqk,bkd->bqd', p.astype(bf16), vb,
                        preferred_element_type=f32)                # (hg*N, Lp, hd) f32
        ob = ob.astype(bf16).reshape(hg, rows_p, hd)
        attn_parts.extend(ob[j] for j in range(hg))

    # Head-concatenated attention output as a value (lane concat, no masked stores).
    attn_in = attn_parts[0] if len(attn_parts) == 1 else jnp.concatenate(attn_parts, axis=-1)
    attn_out = jnp.dot(attn_in, out_w_ref[0], preferred_element_type=f32) + out_b_ref[0]
    act_ref[...] = act_ref[...] + attn_out

    # ----- MLP (norm_first=True):  x <- x + fc2(QuickGELU(fc1(ln2(x)))) -----
    # ln2 is folded into each chunk; one chunk == one sample (seq_pad rows, 8-aligned).
    ln2_w = ln2_w_ref[0]
    ln2_b = ln2_b_ref[0]
    fc1_b = fc1_b_ref[0]
    fc2_b = fc2_b_ref[0]

    def _mlp_chunk(c, carry):
        r0 = pl.multiple_of(c * seq_pad, 8)
        xc = act_ref[pl.ds(r0, seq_pad), :]
        t = _layernorm(xc, ln2_w, ln2_b)
        t = jnp.dot(t.astype(bf16), fc1_w_ref[0], preferred_element_type=f32) + fc1_b
        t = t * jax.nn.sigmoid(1.702 * t)                          # QuickGELU (CLIP)
        t = jnp.dot(t.astype(bf16), fc2_w_ref[0], preferred_element_type=f32) + fc2_b
        act_ref[pl.ds(r0, seq_pad), :] = xc + t
        return carry

    jax.lax.fori_loop(0, batch, _mlp_chunk, 0, unroll=2)

    # ----- last block: ln_post on the class token -> (N, D) output -----
    @pl.when(i == nb - 1)
    def _():
        cls = act_ref[...].reshape(batch, seq_pad, d_model)[:, 0, :]
        out_ref[...] = _layernorm(cls, post_w_ref[...], post_b_ref[...])


# ---------------------------------------------------------------------------
# Wrapper (glue in plain JAX: patch extraction, concat, padding)
# ---------------------------------------------------------------------------

def _vmem_limit_bytes():
    cap = 64 << 20
    try:
        info = pltpu.get_tpu_info()
        cap = int(getattr(info, "vmem_capacity_bytes", cap))
    except Exception:
        pass
    # ~85% of physical VMEM, leaving headroom for compiler-internal scratch.
    return max(32 << 20, min(int(cap * 0.85), 112 << 20))


def _heads_per_group(n, lp, num_heads, hd):
    per_head = max(1, n * lp * lp * 4)
    hg = max(1, min(num_heads, ATTN_SCORE_BUDGET // per_head))
    if hd < 128 and 128 % hd == 0 and hg * hd > 128:
        hg = max(1, (hg * hd // 128) * 128 // hd)   # keep group width a lane multiple
    return int(min(hg, num_heads))


def peft_vit_forward(image, params):
    N, C, Hi, Wi = image.shape
    ps = params['patch_size']
    D = params['embed_dim']
    Hn = params['num_heads']
    B = params['num_blocks']
    DH = params['mlp_dim']
    Hp, Wp = Hi // ps, Wi // ps
    P = Hp * Wp
    L = P + 1

    # --- patch embedding: Conv2d(C, D, k=ps, s=ps, bias=False) as a row-tiled GEMM ---
    K = C * ps * ps
    Kp = _round_up(K, 128)                    # pad contraction dim to lane width
    rows_pe = N * P
    tm = 256 if rows_pe >= 256 else _round_up(rows_pe, 8)
    Mp = _round_up(rows_pe, tm)
    patches = image.astype(jnp.float32).reshape(N, C, Hp, ps, Wp, ps)
    patches = patches.transpose(0, 2, 4, 1, 3, 5).reshape(rows_pe, K)
    patches = jnp.pad(patches, ((0, Mp - rows_pe), (0, Kp - K))).astype(jnp.bfloat16)
    w_t = params['patch_w'].reshape(D, K).T   # (K, D)
    w_t = jnp.pad(w_t, ((0, Kp - K), (0, 0))).astype(jnp.bfloat16)
    tok = pl.pallas_call(
        patch_embed_kernel,
        out_shape=jax.ShapeDtypeStruct((Mp, D), jnp.float32),
        grid=(Mp // tm,),
        in_specs=[pl.BlockSpec((tm, Kp), lambda i: (i, 0)),
                  pl.BlockSpec((Kp, D), lambda i: (0, 0))],
        out_specs=pl.BlockSpec((tm, D), lambda i: (i, 0)),
        compiler_params=pltpu.CompilerParams(dimension_semantics=("parallel",)),
    )(patches, w_t)
    tok = tok[:rows_pe].reshape(N, P, D)

    # --- class token + positional embedding + seq padding (cheap glue, plain JAX) ---
    cls = jnp.broadcast_to(params['class_embedding'].astype(jnp.float32)[None, None, :],
                           (N, 1, D))
    x = jnp.concatenate([cls, tok], axis=1) \
        + params['positional_embedding'][None].astype(jnp.float32)
    Lp = _round_up(L, 8)                      # pad seq so all row tiles are 8-aligned
    if Lp > L:
        x = jnp.pad(x, ((0, 0), (0, Lp - L), (0, 0)))
    x = x.reshape(N * Lp, D).astype(jnp.float32)

    hd = D // Hn
    hg = _heads_per_group(N, Lp, Hn, hd)

    pre_w = params['pre_ln_w'][None, :]
    pre_b = params['pre_ln_b'][None, :]
    post_w = params['post_ln_w'][None, :]
    post_b = params['post_ln_b'][None, :]

    # --- transformer blocks + fused ln_pre / ln_post(cls) ---
    grid_spec = pltpu.PrefetchScalarGridSpec(
        num_scalar_prefetch=0,
        grid=(B,),
        in_specs=[
            pl.BlockSpec(memory_space=pl.ANY),                  # x (raw HBM, DMA'd once)
            pl.BlockSpec((1, D), lambda i: (0, 0)),             # pre_ln_w
            pl.BlockSpec((1, D), lambda i: (0, 0)),             # pre_ln_b
            pl.BlockSpec((1, 1, D), lambda i: (i, 0, 0)),       # ln1_w
            pl.BlockSpec((1, 1, D), lambda i: (i, 0, 0)),       # ln1_b
            pl.BlockSpec((1, D, 3 * D), lambda i: (i, 0, 0)),   # qkv_wT (bf16)
            pl.BlockSpec((1, 1, 3 * D), lambda i: (i, 0, 0)),   # qkv_b
            pl.BlockSpec((1, D, D), lambda i: (i, 0, 0)),       # out_wT (bf16)
            pl.BlockSpec((1, 1, D), lambda i: (i, 0, 0)),       # out_b
            pl.BlockSpec((1, 1, D), lambda i: (i, 0, 0)),       # ln2_w
            pl.BlockSpec((1, 1, D), lambda i: (i, 0, 0)),       # ln2_b
            pl.BlockSpec((1, D, DH), lambda i: (i, 0, 0)),      # fc1_wT (bf16)
            pl.BlockSpec((1, 1, DH), lambda i: (i, 0, 0)),      # fc1_b
            pl.BlockSpec((1, DH, D), lambda i: (i, 0, 0)),      # fc2_wT (bf16)
            pl.BlockSpec((1, 1, D), lambda i: (i, 0, 0)),       # fc2_b
            pl.BlockSpec((1, D), lambda i: (0, 0)),             # post_ln_w
            pl.BlockSpec((1, D), lambda i: (0, 0)),             # post_ln_b
        ],
        out_specs=pl.BlockSpec((N, D), lambda i: (0, 0)),
        scratch_shapes=[
            pltpu.VMEM((N * Lp, D), jnp.float32),               # resident activations
            pltpu.SemaphoreType.DMA(()),
        ],
    )
    # TODO(synk): on v7x (2 TensorCores) add a leading "parallel" grid axis splitting the
    # batch across cores; on 64 MiB-VMEM parts also consider pl.Buffered(1) for the
    # fc1/fc2 weight specs and bf16 resident activations.
    out = pl.pallas_call(
        functools.partial(vit_blocks_kernel, batch=N, seq_len=L, seq_pad=Lp,
                          num_heads=Hn, heads_per_group=hg),
        out_shape=jax.ShapeDtypeStruct((N, D), jnp.float32),
        grid_spec=grid_spec,
        compiler_params=pltpu.CompilerParams(
            dimension_semantics=("arbitrary",),
            vmem_limit_bytes=_vmem_limit_bytes(),
        ),
    )(x, pre_w, pre_b,
      params['ln1_w'], params['ln1_b'],
      params['qkv_wT'], params['qkv_b'],
      params['out_wT'], params['out_b'],
      params['ln2_w'], params['ln2_b'],
      params['fc1_wT'], params['fc1_b'],
      params['fc2_wT'], params['fc2_b'],
      post_w, post_b)

    return out


# ---------------------------------------------------------------------------
# Deterministic parameter init (synthetic; shapes follow PEFT_ViT / CLIP ViT)
# ---------------------------------------------------------------------------

def init_params(key, *, C, ps, D, num_heads, num_blocks, L):
    mlp_dim = 4 * D
    ks = jax.random.split(key, 11)

    def nrm(k, shape, std=0.02, dtype=jnp.float32):
        return (std * jax.random.normal(k, shape)).astype(dtype)

    bf = jnp.bfloat16
    return {
        'patch_size': ps, 'embed_dim': D, 'num_heads': num_heads,
        'num_blocks': num_blocks, 'mlp_dim': mlp_dim,
        'patch_w': nrm(ks[0], (D, C, ps, ps)),                   # Conv2d weight (bias=False)
        'class_embedding': nrm(ks[1], (D,)),
        'positional_embedding': nrm(ks[2], (L, D)),
        'pre_ln_w': jnp.ones((D,), jnp.float32),
        'pre_ln_b': jnp.zeros((D,), jnp.float32),
        'post_ln_w': jnp.ones((D,), jnp.float32),
        'post_ln_b': jnp.zeros((D,), jnp.float32),
        # per-block params stacked on a leading block axis; matmul weights
        # pre-transposed (x @ W.T) and stored in bf16 (f32 accumulation in-kernel).
        'ln1_w': jnp.ones((num_blocks, 1, D), jnp.float32),
        'ln1_b': jnp.zeros((num_blocks, 1, D), jnp.float32),
        'ln2_w': jnp.ones((num_blocks, 1, D), jnp.float32),
        'ln2_b': jnp.zeros((num_blocks, 1, D), jnp.float32),
        'qkv_wT': nrm(ks[3], (num_blocks, D, 3 * D), dtype=bf),
        'qkv_b': nrm(ks[4], (num_blocks, 1, 3 * D)),
        'out_wT': nrm(ks[5], (num_blocks, D, D), dtype=bf),
        'out_b': nrm(ks[6], (num_blocks, 1, D)),
        'fc1_wT': nrm(ks[7], (num_blocks, D, mlp_dim), dtype=bf),
        'fc1_b': nrm(ks[8], (num_blocks, 1, mlp_dim)),
        'fc2_wT': nrm(ks[9], (num_blocks, mlp_dim, D), dtype=bf),
        'fc2_b': nrm(ks[10], (num_blocks, 1, D)),
    }


if __name__ == "__main__":
    key = jax.random.PRNGKey(0)
    k_img, k_par = jax.random.split(key)

    N, C, Hi, Wi, ps = 2, 3, 32, 32, 8
    D, num_heads, num_blocks = 256, 4, 2
    L = (Hi // ps) * (Wi // ps) + 1          # 16 patches + 1 cls token = 17

    image = jax.random.normal(k_img, (N, C, Hi, Wi), jnp.float32)
    params = init_params(k_par, C=C, ps=ps, D=D, num_heads=num_heads,
                         num_blocks=num_blocks, L=L)

    # NOTE: PEFT tuners (LoRA / SSF / AFT / adapter / prompt) are empty in a fresh
    # PEFT_ViT, so the forward path exercised here is the base (tuner-free) path.
    out = peft_vit_forward(image, params)
    jax.block_until_ready(out)
    assert out.shape == (N, D) and out.dtype == jnp.float32
    assert bool(jnp.all(jnp.isfinite(out)))
    print("KERNEL_OK")
</pallas_src>

<mosaic_0001>
module attributes {stable_mosaic.version = 11 : i64} {
  func.func @patch_embed_kernel(%arg0: i32, %arg1: memref<32x256xbf16, #tpu.memory_space<vmem>>, %arg2: memref<256x256xbf16, #tpu.memory_space<vmem>>, %arg3: memref<32x256xf32, #tpu.memory_space<vmem>>) attributes {dimension_semantics = [#tpu.dimension_semantics<parallel>], iteration_bounds = array<i64: 1>, scalar_prefetch = 0 : i64, scratch_operands = 0 : i64, tpu.core_type = #tpu.core_type<tc>, window_params = [{transform_indices = @transform_0, window_bounds = array<i64: 32, 256>}, {pipeline_mode = #tpu.pipeline_mode<synchronous>, transform_indices = @transform_1, window_bounds = array<i64: 256, 256>}, {transform_indices = @transform_2, window_bounds = array<i64: 32, 256>}]} {
    %c0 = arith.constant 0 : index
    %c0_0 = arith.constant 0 : index
    %0 = vector.load %arg1[%c0, %c0_0] : memref<32x256xbf16, #tpu.memory_space<vmem>>, vector<32x256xbf16>
    %c0_1 = arith.constant 0 : index
    %c0_2 = arith.constant 0 : index
    %1 = vector.load %arg2[%c0_1, %c0_2] : memref<256x256xbf16, #tpu.memory_space<vmem>>, vector<256x256xbf16>
    %cst = arith.constant dense<0.000000e+00> : vector<32x256xf32>
    %2 = tpu.matmul %0, %1, %cst {dimension_numbers = #tpu.dot_dimension_numbers<[1], [0], [0], [1], [0, 0, 1, 1], [], []>} : vector<32x256xbf16>, vector<256x256xbf16>, vector<32x256xf32> -> vector<32x256xf32>
    %c0_3 = arith.constant 0 : index
    %c0_4 = arith.constant 0 : index
    %3 = vector.load %arg3[%c0_3, %c0_4] : memref<32x256xf32, #tpu.memory_space<vmem>>, vector<32x256xf32>
    tpu.vector_store %arg3[%c0_3, %c0_4], %2 {strides = array<i32>} : memref<32x256xf32, #tpu.memory_space<vmem>>, vector<32x256xf32>,
    return
  }
  func.func @transform_0(%arg0: i32) -> (i32, i32) {
    %c0_i32 = arith.constant 0 : i32
    %c0_i32_0 = arith.constant 0 : i32
    return %arg0, %c0_i32 : i32, i32
  }
  func.func @transform_1(%arg0: i32) -> (i32, i32) {
    %c0_i32 = arith.constant 0 : i32
    %c0_i32_0 = arith.constant 0 : i32
    %c0_i32_1 = arith.constant 0 : i32
    return %c0_i32, %c0_i32_0 : i32, i32
  }
  func.func @transform_2(%arg0: i32) -> (i32, i32) {
    %c0_i32 = arith.constant 0 : i32
    %c0_i32_0 = arith.constant 0 : i32
    return %arg0, %c0_i32 : i32, i32
  }
}

</mosaic_0001>

<bundles_post_ra>
// kernel: tpu_custom_call.1
= control target key start
LH: loop header
LB: loop body
LE: loop exit
PB: predicated region body
PF: predicated region fallthrough
CT: control target
= control target key end

     0   :  { %7 = vsyncpa [#allocation3], 0  ;;  %s594_s0 = inlined_call_operand.hbm [shape: bf16[32,256], index: 0, kind: input, shape index: {}]   ;;  %s595_s1 = inlined_call_operand.hbm [shape: bf16[256,256], index: 1, kind: input, shape index: {}]   ;;  %s596_s2 = inlined_call_operand.hbm [shape: f32[32,256], index: 2, kind: output, shape index: {}]  }
   0x1   :  { %8 = vsyncpa [#allocation6], 0 }
   0x2   :  { %9 = vsyncpa [#allocation4], 0  ;;  %s536_s9 = smov [#allocation2]   ;;  %s464_s13 = scalar_lea.hbm %s594_s0, 512 }
   0x3   :  { %s15_s10 = sshll.u32 %s536_s9, 4  ;;  %p465_p0 = scmp.ne.s32.totalorder %s594_s0, %s464_s13  ;;  %s16_s10 = int_to_ptr.vmem [resolvable:$true] %s15_s10 }
   0x4   :  { %p468_p1 = scmp.lt.u32.totalorder %s464_s13, %s594_s0 }
   0x6   :  { %p470_p2 = pnand %p468_p1, %p465_p0 }
   0x8   :  { %473 = shalt.err (!%p470_p2)
}
   0x9   :  { %s474_s18 = scalar_lea.vmem %s16_s10, 512  ;;  %p479_p4 = scmp.lt.s32.totalorder %s16_s10, %s16_s10 }
   0xa   :  { %p475_p3 = scmp.ne.s32.totalorder %s16_s10, %s474_s18  ;;  %p480_p5 = scmp.lt.s32.totalorder %s474_s18, %s474_s18 }
   0xc   :  { %p481_p6 = por %p480_p5, %p479_p4 }
   0xe   :  { %p482_p7 = pnand %p481_p6, %p475_p3 }
  0x10   :  { %485 = shalt.err (!%p482_p7)
}
  0x11   :  { %s537_s19 = smov 128   ;;  %s538_s20 = smov 8  }
  0x12   :  { %21 = dma.hbm_to_vmem [thread:$0]  %s594_s0, 512, %s16_s10, [#allocation3], %s537_s19, %s537_s19, %s538_s20  }
  0x13   :  { %s539_s23 = smov [#allocation5]   ;;  %s486_s27 = scalar_lea.hbm %s595_s1, 4096 }
  0x14   :  { %s27_s24 = sshll.u32 %s539_s23, 4  ;;  %p487_p8 = scmp.ne.s32.totalorder %s595_s1, %s486_s27  ;;  %s28_s24 = int_to_ptr.vmem [resolvable:$true] %s27_s24 }
  0x15   :  { %p490_p9 = scmp.lt.u32.totalorder %s486_s27, %s595_s1 }
  0x17   :  { %p492_p10 = pnand %p490_p9, %p487_p8 }
  0x19   :  { %495 = shalt.err (!%p492_p10)
}
  0x1a   :  { %s496_s4 = scalar_lea.vmem %s28_s24, 4096  ;;  %p501_p12 = scmp.lt.s32.totalorder %s28_s24, %s28_s24 }
  0x1b   :  { %p497_p11 = scmp.ne.s32.totalorder %s28_s24, %s496_s4  ;;  %p502_p13 = scmp.lt.s32.totalorder %s496_s4, %s496_s4 }
  0x1d   :  { %p503_p0 = por %p502_p13, %p501_p12 }
  0x1f   :  { %p504_p1 = pnand %p503_p0, %p497_p11 }
  0x21   :  { %507 = shalt.err (!%p504_p1)
}
  0x22   :  { %33 = dma.hbm_to_vmem [thread:$0]  %s595_s1, 4096, %s28_s24, [#allocation6], %s537_s19, %s537_s19, %s538_s20  }
  0x23   :  { %530 = dma.done.wait [#allocation3], 512  }
  0x24   :  { %531 = vsyncadd [#allocation3], 4294966784 }
  0x25   :  { %532 = dma.done.wait [#allocation6], 4096  }
  0x26   :  { %533 = vsyncadd [#allocation6], 4294963200  ;;  %v410_v0 = vld [vmem:[#allocation5 + $0x4] ss:$8 sps:$4 sm:$0xff]   ;;  %v412_v1 = vld [vmem:[#allocation5] ss:$8 sps:$4 sm:$0xff]  }
  0x27   :  { %256 = vmatprep.subr.bf16.mxu0 %v410_v0  ;;  %371 = vmatprep.subr.bf16.mxu1 %v410_v0  ;;  %v413_v2 = vld [vmem:[#allocation5 + $0x14] ss:$8 sps:$4 sm:$0xff]   ;;  %v415_v3 = vld [vmem:[#allocation5 + $0x10] ss:$8 sps:$4 sm:$0xff]   ;;  %v416_v4 = vld [vmem:[#allocation5 + $0x24] ss:$8 sps:$4 sm:$0xff]  }
  0x28   :  { %257 = vmatpush1.bf16.msra.mxu0 %v412_v1  ;;  %387 = vmatpush1.bf16.msra.mxu1 %v412_v1  ;;  %v418_v5 = vld [vmem:[#allocation5 + $0x20] ss:$8 sps:$4 sm:$0xff]   ;;  %v419_v6 = vld [vmem:[#allocation5 + $0x34] ss:$8 sps:$4 sm:$0xff]   ;;  %v421_v7 = vld [vmem:[#allocation5 + $0x30] ss:$8 sps:$4 sm:$0xff]  }
  0x29   :  { %258 = vmatprep.subr.bf16.mxu0 %v413_v2  ;;  %372 = vmatprep.subr.bf16.mxu1 %v413_v2  ;;  %v422_v8 = vld [vmem:[#allocation5 + $0x44] ss:$8 sps:$4 sm:$0xff]   ;;  %v424_v9 = vld [vmem:[#allocation5 + $0x40] ss:$8 sps:$4 sm:$0xff]   ;;  %v425_v10 = vld [vmem:[#allocation5 + $0x54] ss:$8 sps:$4 sm:$0xff]  }
  0x2a   :  { %v427_v11 = vld [vmem:[#allocation5 + $0x50] ss:$8 sps:$4 sm:$0xff]   ;;  %v428_v12 = vld [vmem:[#allocation5 + $0x64] ss:$8 sps:$4 sm:$0xff]   ;;  %v430_v14 = vld [vmem:[#allocation5 + $0x60] ss:$8 sps:$4 sm:$0xff]  }
  0x2b   :  { %v460_v13 = vld [vmem:[#allocation2 + $0x4] ss:$8 sps:$4 sm:$0xff]   ;;  %v463_v15 = vld [vmem:[#allocation2 + $0x14] ss:$8 sps:$4 sm:$0xff]   ;;  %v433_v17 = vld [vmem:[#allocation5 + $0x70] ss:$8 sps:$4 sm:$0xff]  }
  0x2c   :  { %259 = vmatpush1.bf16.msra.mxu0 %v415_v3  ;;  %388 = vmatpush1.bf16.msra.mxu1 %v415_v3  ;;  %v431_v16 = vld [vmem:[#allocation5 + $0x74] ss:$8 sps:$4 sm:$0xff]   ;;  %v434_v18 = vld [vmem:[#allocation5 + $0x84] ss:$8 sps:$4 sm:$0xff]   ;;  %v436_v19 = vld [vmem:[#allocation5 + $0x80] ss:$8 sps:$4 sm:$0xff]  }
  0x2d   :  { %260 = vmatprep.subr.bf16.mxu0 %v416_v4  ;;  %373 = vmatprep.subr.bf16.mxu1 %v416_v4  ;;  %v437_v20 = vld [vmem:[#allocation5 + $0x94] ss:$8 sps:$4 sm:$0xff]   ;;  %v439_v21 = vld [vmem:[#allocation5 + $0x90] ss:$8 sps:$4 sm:$0xff]   ;;  %v440_v22 = vld [vmem:[#allocation5 + $0xa4] ss:$8 sps:$4 sm:$0xff]  }
  0x2e   :  { %288 = vmatprep.mubr.bf16.mxu0 %v460_v13  ;;  %298 = vmatprep.mubr.bf16.mxu1 %v463_v15  ;;  %v442_v23 = vld [vmem:[#allocation5 + $0xa0] ss:$8 sps:$4 sm:$0xff]   ;;  %v443_v24 = vld [vmem:[#allocation5 + $0xb4] ss:$8 sps:$4 sm:$0xff]   ;;  %v445_v25 = vld [vmem:[#allocation5 + $0xb0] ss:$8 sps:$4 sm:$0xff]  }
  0x2f   :  { %v446_v26 = vld [vmem:[#allocation5 + $0xc4] ss:$8 sps:$4 sm:$0xff]   ;;  %v448_v27 = vld [vmem:[#allocation5 + $0xc0] ss:$8 sps:$4 sm:$0xff]   ;;  %v449_v28 = vld [vmem:[#allocation5 + $0xd4] ss:$8 sps:$4 sm:$0xff]  }
  0x30   :  { %261 = vmatpush1.bf16.msra.mxu0 %v418_v5  ;;  %389 = vmatpush1.bf16.msra.mxu1 %v418_v5  ;;  %v451_v29 = vld [vmem:[#allocation5 + $0xd0] ss:$8 sps:$4 sm:$0xff]   ;;  %v452_v30 = vld [vmem:[#allocation5 + $0xe4] ss:$8 sps:$4 sm:$0xff]   ;;  %v454_v31 = vld [vmem:[#allocation5 + $0xe0] ss:$8 sps:$4 sm:$0xff]  }
  0x31   :  { %262 = vmatprep.subr.bf16.mxu0 %v419_v6  ;;  %374 = vmatprep.subr.bf16.mxu1 %v419_v6  ;;  %v455_v32 = vld [vmem:[#allocation5 + $0xf4] ss:$8 sps:$4 sm:$0xff]   ;;  %v457_v33 = vld [vmem:[#allocation5 + $0xf0] ss:$8 sps:$4 sm:$0xff]   ;;  %v458_v34 = vld [vmem:[#allocation2] ss:$8 sps:$4 sm:$0xff]  }
  0x32   :  { %v461_v35 = vld [vmem:[#allocation2 + $0x10] ss:$8 sps:$4 sm:$0xff]   ;;  %s540_s1 = smov [#allocation7]  }
  0x33   :  { %s322_s6 = sshll.u32 %s540_s1, 4  ;;  %s323_s6 = int_to_ptr.vmem [resolvable:$true] %s322_s6 }
  0x34   :  { %263 = vmatpush1.bf16.msra.mxu0 %v421_v7  ;;  %390 = vmatpush1.bf16.msra.mxu1 %v421_v7  ;;  %s508_s7 = scalar_lea.vmem %s323_s6, 1024  ;;  %p513_p3 = scmp.lt.s32.totalorder %s323_s6, %s323_s6 }
  0x35   :  { %264 = vmatprep.subr.bf16.mxu0 %v422_v8  ;;  %375 = vmatprep.subr.bf16.mxu1 %v422_v8  ;;  %p509_p2 = scmp.ne.s32.totalorder %s323_s6, %s508_s7  ;;  %p514_p4 = scmp.lt.s32.totalorder %s508_s7, %s508_s7 }
  0x37   :  { %p515_p5 = por %p514_p4, %p513_p3 }
  0x38   :  { %265 = vmatpush1.bf16.msra.mxu0 %v424_v9  ;;  %391 = vmatpush1.bf16.msra.mxu1 %v424_v9 }
  0x39   :  { %266 = vmatprep.subr.bf16.mxu0 %v425_v10  ;;  %376 = vmatprep.subr.bf16.mxu1 %v425_v10  ;;  %p516_p6 = pnand %p515_p5, %p509_p2 }
  0x3c   :  { %267 = vmatpush1.bf16.msra.mxu0 %v427_v11  ;;  %392 = vmatpush1.bf16.msra.mxu1 %v427_v11 }
  0x3d   :  { %268 = vmatprep.subr.bf16.mxu0 %v428_v12  ;;  %377 = vmatprep.subr.bf16.mxu1 %v428_v12 }
  0x40   :  { %269 = vmatpush1.bf16.msra.mxu0 %v430_v14  ;;  %393 = vmatpush1.bf16.msra.mxu1 %v430_v14 }
  0x41   :  { %270 = vmatprep.subr.bf16.mxu0 %v431_v16  ;;  %378 = vmatprep.subr.bf16.mxu1 %v431_v16 }
  0x44   :  { %271 = vmatpush1.bf16.msra.mxu0 %v433_v17  ;;  %394 = vmatpush1.bf16.msra.mxu1 %v433_v17 }
  0x45   :  { %272 = vmatprep.subr.bf16.mxu0 %v434_v18  ;;  %379 = vmatprep.subr.bf16.mxu1 %v434_v18 }
  0x48   :  { %273 = vmatpush1.bf16.msra.mxu0 %v436_v19  ;;  %395 = vmatpush1.bf16.msra.mxu1 %v436_v19 }
  0x49   :  { %274 = vmatprep.subr.bf16.mxu0 %v437_v20  ;;  %380 = vmatprep.subr.bf16.mxu1 %v437_v20 }
  0x4c   :  { %275 = vmatpush1.bf16.msra.mxu0 %v439_v21  ;;  %396 = vmatpush1.bf16.msra.mxu1 %v439_v21 }
  0x4d   :  { %276 = vmatprep.subr.bf16.mxu0 %v440_v22  ;;  %381 = vmatprep.subr.bf16.mxu1 %v440_v22 }
  0x50   :  { %277 = vmatpush1.bf16.msra.mxu0 %v442_v23  ;;  %397 = vmatpush1.bf16.msra.mxu1 %v442_v23 }
  0x51   :  { %278 = vmatprep.subr.bf16.mxu0 %v443_v24  ;;  %382 = vmatprep.subr.bf16.mxu1 %v443_v24 }
  0x54   :  { %279 = vmatpush1.bf16.msra.mxu0 %v445_v25  ;;  %398 = vmatpush1.bf16.msra.mxu1 %v445_v25 }
  0x55   :  { %280 = vmatprep.subr.bf16.mxu0 %v446_v26  ;;  %383 = vmatprep.subr.bf16.mxu1 %v446_v26 }
  0x58   :  { %281 = vmatpush1.bf16.msra.mxu0 %v448_v27  ;;  %399 = vmatpush1.bf16.msra.mxu1 %v448_v27 }
  0x59   :  { %282 = vmatprep.subr.bf16.mxu0 %v449_v28  ;;  %384 = vmatprep.subr.bf16.mxu1 %v449_v28 }
  0x5c   :  { %283 = vmatpush1.bf16.msra.mxu0 %v451_v29  ;;  %400 = vmatpush1.bf16.msra.mxu1 %v451_v29 }
  0x5d   :  { %284 = vmatprep.subr.bf16.mxu0 %v452_v30  ;;  %385 = vmatprep.subr.bf16.mxu1 %v452_v30 }
  0x60   :  { %285 = vmatpush1.bf16.msra.mxu0 %v454_v31  ;;  %401 = vmatpush1.bf16.msra.mxu1 %v454_v31 }
  0x61   :  { %286 = vmatprep.subr.bf16.mxu0 %v455_v32  ;;  %386 = vmatprep.subr.bf16.mxu1 %v455_v32 }
  0x64   :  { %287 = vmatpush1.bf16.msra.mxu0 %v457_v33  ;;  %402 = vmatpush1.bf16.msra.mxu1 %v457_v33 }
  0x67   :  { %289 = vmatmul.mubr.bf16.vlgmr.msra.gmra.mrb[0].mxu0 %v458_v34  ;;  %299 = vmatmul.mubr.bf16.vlgmr.msra.gmra.mrb[0].mxu1 %v461_v35 }
 0x13a   :  { %v290_v36 = vpop.f32.mrb[0].mxu0  ;;  %v300_v37 = vpop.f32.mrb[0].mxu1 }
 0x13b   :  { %309 = vst [vmem:[#allocation7] sm:$0xff] %v290_v36  ;;  %313 = vst [vmem:[#allocation7 + $0x20] sm:$0xff] %v300_v37  ;;  %v292_v38 = vpop.f32.mrb[1].mxu0  ;;  %v302_v39 = vpop.f32.mrb[1].mxu1 }
 0x13c   :  { %310 = vst [vmem:[#allocation7 + $0x8] sm:$0xff] %v292_v38  ;;  %314 = vst [vmem:[#allocation7 + $0x28] sm:$0xff] %v302_v39  ;;  %v294_v40 = vpop.f32.mrb[2].mxu0  ;;  %v304_v41 = vpop.f32.mrb[2].mxu1 }
 0x13d   :  { %311 = vst [vmem:[#allocation7 + $0x10] sm:$0xff] %v294_v40  ;;  %315 = vst [vmem:[#allocation7 + $0x30] sm:$0xff] %v304_v41  ;;  %v296_v42 = vpop.f32.mrb[3].mxu0  ;;  %v306_v43 = vpop.f32.mrb[3].mxu1 }
 0x13e   :  { %312 = vst [vmem:[#allocation7 + $0x18] sm:$0xff] %v296_v42  ;;  %316 = vst [vmem:[#allocation7 + $0x38] sm:$0xff] %v306_v43 }
 0x13f   :  { %519 = shalt.err (!%p516_p6)
}
 0x140   :  { %s520_s10 = scalar_lea.hbm %s596_s2, 1024 }
 0x141   :  { %p521_p7 = scmp.ne.s32.totalorder %s596_s2, %s520_s10  ;;  %p524_p8 = scmp.lt.u32.totalorder %s520_s10, %s596_s2 }
 0x143   :  { %p526_p9 = pnand %p524_p8, %p521_p7 }
 0x145   :  { %529 = shalt.err (!%p526_p9)
}
 0x146   :  { %s541_s15 = smov 256   ;;  %s542_s16 = smov 16  }
 0x147   :  { %328 = dma.vmem_to_hbm [thread:$0]  %s323_s6, 1024, %s596_s2, [#allocation4], %s541_s15, %s541_s15, %s542_s16  }
 0x148   :  { %534 = dma.done.wait [#allocation4], 1024  }
 0x149   :  { %535 = vsyncadd [#allocation4], 4294966272 }
 0x14a   :  { %332 = vsyncpa [#allocation3], 1 }
 0x14b   :  { %333 = vsyncpa [#allocation6], 1 }
 0x14c   :  { %334 = vsyncpa [#allocation4], 1 }

</bundles_post_ra>
